<compile_context>
chip_gen: v7x
topology: tpu7x:2x2x1
jax: 0.10.0
libtpu: 0.0.40
codegen_flags: <defaults>
</compile_context>

<pallas_src>
import functools

import jax
import jax.numpy as jnp
from jax.experimental import pallas as pl
from jax.experimental.pallas import tpu as pltpu

EPS = 1e-5


def _round_up(x, m):
    return (x + m - 1) // m * m


def _vmem_budget_bytes():
    """Generation-aware VMEM budget: ~75% of physical per-core VMEM."""
    try:
        cap = int(pltpu.get_tpu_info().vmem_capacity_bytes)
    except Exception:
        cap = 64 << 20  # conservative fallback (v7x per-TensorCore VMEM)
    return (cap * 3) // 4


def _featurizer_kernel(nw_ref, x_ref, o_ref, *scratch, normalize):
    """One (row-tile i, layer l) grid step.

    nw_ref : SMEM (L,)       softmax-normalized layer weights (scalar prefetch)
    x_ref  : VMEM (tile, D)  hidden states of layer l for this row tile
    o_ref  : VMEM (tile, D)  output tile (same block index for every l -> resident)
    scratch: optional f32 VMEM accumulator (only when o_ref dtype != f32)
    """
    l = pl.program_id(1)
    # f32 outputs accumulate directly into the resident output block.
    acc_ref = scratch[0] if scratch else o_ref

    @pl.when(l == 0)
    def _():
        acc_ref[...] = jnp.zeros_like(acc_ref)

    x = x_ref[...].astype(jnp.float32)  # (tile, D)
    w = nw_ref[l]                       # scalar layer weight

    if normalize:
        mean = jnp.mean(x, axis=-1, keepdims=True)
        xc = x - mean                                    # reused below (one vsub)
        var = jnp.mean(xc * xc, axis=-1, keepdims=True)
        scale = w * jax.lax.rsqrt(var + EPS)             # weight folded into scale
        acc_ref[...] += xc * scale
    else:
        acc_ref[...] += w * x

    if scratch:
        @pl.when(l == pl.num_programs(1) - 1)
        def _():
            o_ref[...] = acc_ref[...].astype(o_ref.dtype)


def _select_tile(N, D, in_dtype, tile_n):
    """Pick a row-tile size from the VMEM budget and dtype sublane packing."""
    itemsize = jnp.dtype(in_dtype).itemsize
    sublane = max(8, 32 // itemsize)          # 8 rows f32, 16 rows bf16, 32 int8
    acc_bytes = 0 if jnp.dtype(in_dtype) == jnp.dtype(jnp.float32) else 4
    # double-buffered input + double-buffered output + optional f32 accumulator
    per_row = D * (2 * itemsize + 2 * itemsize + acc_bytes)
    budget = _vmem_budget_bytes()

    tile = max(sublane, (min(tile_n, N) // sublane) * sublane)
    # Shrink until the working set fits the generation-aware VMEM budget.
    while tile > sublane and tile * per_row + (2 << 20) > budget:
        tile = max(sublane, ((tile // 2) // sublane) * sublane)
    # Keep >= 2 programs on the parallel row axis (v7x megacore) when possible.
    if N > 2 * sublane:
        tile = min(tile, _round_up(pl.cdiv(N, 2), sublane))
    return tile, per_row, budget


def featurizer_forward(feats, weights, *, normalize=True, tile_n=2048):
    """feats: (L, B, T, D), weights: (L,) -> (B, T, D).

    Pallas port of espnet_onnx s3prl Featurizer.forward for the
    feature_selection='hidden_states' (L > 1) path.  Accepts f32 or bf16 feats
    (bf16 halves the dominant HBM read traffic; compute is always f32).
    """
    L, B, T, D = feats.shape
    if L == 1:
        # single-layer stack is a pass-through in the reference module
        return feats[0]

    N = B * T
    x = feats.reshape(L, N, D)

    # softmax over the L tiny layer weights: parameter glue, plain JAX
    norm_w = jax.nn.softmax(weights.astype(jnp.float32), axis=-1)

    tile, per_row, budget = _select_tile(N, D, feats.dtype, tile_n)
    vmem_limit = int(min(budget, max(32 << 20, tile * per_row + (8 << 20))))

    use_scratch = jnp.dtype(feats.dtype) != jnp.dtype(jnp.float32)
    scratch_shapes = [pltpu.VMEM((tile, D), jnp.float32)] if use_scratch else []

    kernel = functools.partial(_featurizer_kernel, normalize=normalize)

    out = pl.pallas_call(
        kernel,
        out_shape=jax.ShapeDtypeStruct((N, D), feats.dtype),
        grid_spec=pltpu.PrefetchScalarGridSpec(
            num_scalar_prefetch=1,
            # L is a grid reduction axis -> per-step VMEM independent of L.
            # Row axis uses non-divisible blocking: the partial last block's
            # don't-care rows never mix with valid rows (row-wise math) and
            # are masked on writeback -> no jnp.pad copy of the input.
            grid=(pl.cdiv(N, tile), L),
            in_specs=[
                pl.BlockSpec((None, tile, D), lambda i, l, nw: (l, i, 0)),
            ],
            out_specs=pl.BlockSpec((tile, D), lambda i, l, nw: (i, 0)),
            scratch_shapes=scratch_shapes,
        ),
        compiler_params=pltpu.CompilerParams(
            # Row axis parallel (uses both v7x TensorCores), L axis reduction.
            dimension_semantics=("parallel", "arbitrary"),
            vmem_limit_bytes=vmem_limit,
        ),
    )(norm_w, x)

    return out.reshape(B, T, D)


def _reference(feats, weights, normalize=True):
    # pure-JAX reference mirroring the PyTorch forward
    L = feats.shape[0]
    x = feats.astype(jnp.float32)
    if normalize:
        mean = jnp.mean(x, axis=-1, keepdims=True)
        var = jnp.mean(jnp.square(x - mean), axis=-1, keepdims=True)
        x = (x - mean) / jnp.sqrt(var + EPS)
    origin_shape = x.shape[1:]
    x = x.reshape(L, -1)
    nw = jax.nn.softmax(weights.astype(jnp.float32), axis=-1)
    wf = jnp.sum(nw[:, None] * x, axis=0)
    return wf.reshape(origin_shape)


if __name__ == "__main__":
    # Small shapes consistent with the forward: L layers of (B, T, D) features.
    # T=9 makes B*T=18 non-divisible by the row tile, exercising the
    # partial-edge-block path (no padding copy); D=128 keeps lanes dense.
    L, B, T, D = 4, 2, 9, 128
    key = jax.random.PRNGKey(0)
    k_feats, k_w = jax.random.split(key)
    feats = jax.random.normal(k_feats, (L, B, T, D), dtype=jnp.float32)
    weights = jax.random.normal(k_w, (L,), dtype=jnp.float32)  # layer weights

    # f32 path: accumulates directly in the output block (no scratch).
    out = jax.block_until_ready(featurizer_forward(feats, weights, normalize=True))
    ref = _reference(feats, weights, normalize=True)
    assert out.shape == (B, T, D)
    assert jnp.allclose(out, ref, rtol=1e-5, atol=1e-5)

    # bf16 streaming path: halves HBM read traffic, f32 compute + f32 scratch.
    feats_bf16 = feats.astype(jnp.bfloat16)
    out_bf16 = jax.block_until_ready(
        featurizer_forward(feats_bf16, weights, normalize=True))
    ref_bf16 = _reference(feats_bf16.astype(jnp.float32), weights, normalize=True)
    assert out_bf16.dtype == jnp.bfloat16
    assert jnp.allclose(out_bf16.astype(jnp.float32), ref_bf16, rtol=2e-2, atol=5e-2)

    print("KERNEL_OK")
</pallas_src>

<mosaic_0001>
module attributes {stable_mosaic.version = 11 : i64} {
  func.func @_featurizer_kernel(%arg0: i32, %arg1: i32, %arg2: memref<4xf32, #tpu.memory_space<smem>>, %arg3: memref<1x16x128xf32, #tpu.memory_space<vmem>>, %arg4: memref<16x128xf32, #tpu.memory_space<vmem>>) attributes {dimension_semantics = [#tpu.dimension_semantics<parallel>, #tpu.dimension_semantics<arbitrary>], iteration_bounds = array<i64: 2, 4>, scalar_prefetch = 1 : i64, scratch_operands = 0 : i64, tpu.core_type = #tpu.core_type<tc>, window_params = [{transform_indices = @transform_0, window_bounds = array<i64: 1, 16, 128>}, {transform_indices = @transform_1, window_bounds = array<i64: 16, 128>}]} {
    %c0_i32 = arith.constant 0 : i32
    %0 = arith.cmpi eq, %arg1, %c0_i32 : i32
    %1 = arith.extui %0 : i1 to i32
    %c0_i32_0 = arith.constant 0 : i32
    %2 = arith.cmpi ne, %1, %c0_i32_0 : i32
    scf.if %2 {
      %cst_11 = arith.constant 0.000000e+00 : f32
      %28 = vector.broadcast %cst_11 : f32 to vector<16x128xf32>
      %c0_12 = arith.constant 0 : index
      %c0_13 = arith.constant 0 : index
      %29 = vector.load %arg4[%c0_12, %c0_13] : memref<16x128xf32, #tpu.memory_space<vmem>>, vector<16x128xf32>
      tpu.vector_store %arg4[%c0_12, %c0_13], %28 {strides = array<i32>} : memref<16x128xf32, #tpu.memory_space<vmem>>, vector<16x128xf32>,
    } else {
    }
    %c0 = arith.constant 0 : index
    %c0_1 = arith.constant 0 : index
    %c0_2 = arith.constant 0 : index
    %3 = vector.load %arg3[%c0, %c0_1, %c0_2] : memref<1x16x128xf32, #tpu.memory_space<vmem>>, vector<1x16x128xf32>
    %4 = vector.shape_cast %3 : vector<1x16x128xf32> to vector<16x128xf32>
    %5 = arith.index_cast %arg1 : i32 to index
    %6 = memref.load %arg2[%5] : memref<4xf32, #tpu.memory_space<smem>>
    %cst = arith.constant dense<0.000000e+00> : vector<16xf32>
    %7 = vector.multi_reduction <add>, %4, %cst [1] : vector<16x128xf32> to vector<16xf32>
    %8 = vector.shape_cast %7 : vector<16xf32> to vector<16x1xf32>
    %cst_3 = arith.constant 1.280000e+02 : f32
    %9 = vector.broadcast %cst_3 : f32 to vector<16x1xf32>
    %10 = arith.divf %8, %9 : vector<16x1xf32>
    %11 = vector.broadcast %10 : vector<16x1xf32> to vector<16x128xf32>
    %12 = arith.subf %4, %11 : vector<16x128xf32>
    %13 = arith.mulf %12, %12 : vector<16x128xf32>
    %cst_4 = arith.constant dense<0.000000e+00> : vector<16xf32>
    %14 = vector.multi_reduction <add>, %13, %cst_4 [1] : vector<16x128xf32> to vector<16xf32>
    %15 = vector.shape_cast %14 : vector<16xf32> to vector<16x1xf32>
    %cst_5 = arith.constant 1.280000e+02 : f32
    %16 = vector.broadcast %cst_5 : f32 to vector<16x1xf32>
    %17 = arith.divf %15, %16 : vector<16x1xf32>
    %cst_6 = arith.constant 9.99999974E-6 : f32
    %18 = vector.broadcast %cst_6 : f32 to vector<16x1xf32>
    %19 = arith.addf %17, %18 : vector<16x1xf32>
    %20 = math.rsqrt %19 : vector<16x1xf32>
    %21 = vector.broadcast %6 : f32 to vector<16x1xf32>
    %22 = arith.mulf %21, %20 : vector<16x1xf32>
    %c0_7 = arith.constant 0 : index
    %c0_8 = arith.constant 0 : index
    %23 = vector.load %arg4[%c0_7, %c0_8] : memref<16x128xf32, #tpu.memory_space<vmem>>, vector<16x128xf32>
    %24 = vector.broadcast %22 : vector<16x1xf32> to vector<16x128xf32>
    %25 = arith.mulf %12, %24 : vector<16x128xf32>
    %26 = arith.addf %23, %25 : vector<16x128xf32>
    %c0_9 = arith.constant 0 : index
    %c0_10 = arith.constant 0 : index
    %27 = vector.load %arg4[%c0_9, %c0_10] : memref<16x128xf32, #tpu.memory_space<vmem>>, vector<16x128xf32>
    tpu.vector_store %arg4[%c0_9, %c0_10], %26 {strides = array<i32>} : memref<16x128xf32, #tpu.memory_space<vmem>>, vector<16x128xf32>,
    return
  }
  func.func @transform_0(%arg0: i32, %arg1: i32, %arg2: memref<4xf32, #tpu.memory_space<smem>>) -> (i32, i32, i32) {
    %c0_i32 = arith.constant 0 : i32
    %c0_i32_0 = arith.constant 0 : i32
    return %arg1, %arg0, %c0_i32 : i32, i32, i32
  }
  func.func @transform_1(%arg0: i32, %arg1: i32, %arg2: memref<4xf32, #tpu.memory_space<smem>>) -> (i32, i32) {
    %c0_i32 = arith.constant 0 : i32
    %c0_i32_0 = arith.constant 0 : i32
    return %arg0, %c0_i32 : i32, i32
  }
}

</mosaic_0001>

<bundles_post_ra>
// kernel: tpu_custom_call.1
= control target key start
LH: loop header
LB: loop body
LE: loop exit
PB: predicated region body
PF: predicated region fallthrough
CT: control target
= control target key end

     0   :  { %s712_s0 = inlined_call_operand.vmem [shape: f32[4], index: 0, kind: input, shape index: {}]   ;;  %s713_s1 = inlined_call_operand.vmem [shape: f32[4,18,128], index: 1, kind: input, shape index: {}]   ;;  %s714_s2 = inlined_call_operand.hbm [shape: f32[18,128], index: 2, kind: output, shape index: {}]  }
   0x1   :  { %s7_s11 = sshll.u32 %s712_s0, 4  ;;  %s8_s11 = int_to_ptr.vmem [resolvable:$true] %s7_s11 }
   0x2   :  { %s413_s12 = scalar_lea.vmem %s8_s11, 16  ;;  %p418_p1 = scmp.lt.s32.totalorder %s8_s11, %s8_s11 }
   0x3   :  { %p414_p0 = scmp.ne.s32.totalorder %s8_s11, %s413_s12  ;;  %p419_p2 = scmp.lt.s32.totalorder %s413_s12, %s413_s12 }
   0x5   :  { %p420_p3 = por %p419_p2, %p418_p1 }
   0x7   :  { %p421_p4 = pnand %p420_p3, %p414_p0 }
   0x9   :  { %424 = shalt.err (!%p421_p4)  }
   0xa   :  { %s523_s13 = smov [#allocation3]  }
   0xb   :  { %10 = dma.vmem_to_smem %s8_s11, 16, %s523_s13, [#allocation2] }
   0xc   :  { %485 = dma.done.wait [#allocation2], 16 }
   0xd   :  { %486 = vsyncadd [#allocation2], 4294967280 }
   0xe   :  { %12 = sfence }
   0xf   :  { %13 = vsyncpa [#allocation5], 0 }
  0x10   :  { %15 = vsyncpa [#allocation5 + $0x1], 0  ;;  %s546_s14 = smov 0   ;;  %s548_s15 = smov 0  }
  0x11   :  { %s550_s0 = smov 0   ;;  %s552_s16 = smov 0  }
  0x12   :  { %s554_s17 = smov 0   ;;  %s556_s18 = smov 0  }
  0x13   :  { %s558_s19 = smov 0   ;;  %s560_s20 = smov 0  }
  0x14 LB: > { %s315_s21 = sadd.s32 4294967295, %s521_s20   ;;  %s316_s22 = sadd.s32 4294967294, %s521_s20   ;;  %s521_s20 = sphi %s560_s20, %s21_s20   ;;  %s517_s19 = sphi %s558_s19, %s723_s19   ;;  %s513_s18 = sphi %s556_s18, %s722_s18   ;;  %s509_s17 = sphi %s554_s17, %s721_s17   ;;  %s505_s16 = sphi %s552_s16, %s720_s16   ;;  %s501_s0 = sphi %s550_s0, %s719_s0   ;;  %s497_s15 = sphi %s548_s15, %s718_s15   ;;  %s493_s14 = sphi %s546_s14, %s717_s14  }
  0x15   : > { %s30_s23 = sadd.s32 1, %s513_s18  ;;  %s33_s24 = sadd.s32 1, %s517_s19 }
  0x16   : > { %p31_p5 = scmp.ge.s32.totalorder %s30_s23, 4  ;;  %p78_p6 = scmp.ne.s32.totalorder %s501_s0, %s497_s15 }
  0x17   : > { %p79_p7 = scmp.eq.s32.totalorder %s315_s21, 7  ;;  %p84_p9 = scmp.ne.s32.totalorder %s497_s15, %s493_s14 }
  0x18   : > { %s725_s23 = smov (%p31_p5, %s30_s23), 0  ;;  %s727_s24 = smov (!%p31_p5, %s33_s24), %s517_s19 }
  0x19   : > { %p595_p8 = por %p79_p7, %p78_p6  ;;  %p35_p10 = scmp.ge.s32.totalorder %s727_s24, 2 }
  0x1a   : > { %p85_p11 = scmp.eq.s32.totalorder %s316_s22, 7  ;;  %p319_p12 = scmp.ge.s32.totalorder %s521_s20, 1 }
  0x1b   : > { %p124_p13 = scmp.lt.s32.totalorder %s521_s20, 9  ;;  %s729_s24 = smov (%p35_p10, %s727_s24), 0 }
  0x1c   : > { %p605_p0 = por %p85_p11, %p84_p9  ;;  %s65_s27 = ssub.s32 %s517_s19, %s729_s24 }
  0x1d   : > { %p125_p1 = pnand %p319_p12, %p124_p13  ;;  %s68_s28 = sadd.s32 1, %s501_s0 }
  0x1e   : > { %p66_p2 = scmp.eq.s32.totalorder %s65_s27, 0  ;;  %s149_s30 = sand.u32 (!%p125_p1), 1, %s497_s15  }
  0x1f   : > { %128 = sbr.rel (%p125_p1) target bundleno = 393 (0x189), region = 24  ;;  %s617_s3 = sshll.u32 (!%p125_p1), %s509_s17, 1 }
  0x20   : > { %s613_s29 = scalar_select %p66_p2, %s501_s0, %s68_s28  }
  0x21   : > { %s320_s4 = sshll.u32 (!%p125_p1), %s149_s30, 4  ;;  %p157_p3 = scmp.lt.s32.totalorder (!%p125_p1), %s505_s16, 3 }
  0x22   : > { %p159_p4 = scmp.lt.s32.totalorder (!%p125_p1), %s617_s3, 2  ;;  %s628_s13 = scalar_lea.vmem (!%p125_p1), [#allocation4], %s320_s4 }
  0x23   : > { %p323_p5 = scmp.ne.s32.totalorder (!%p125_p1), %s505_s16, 0 }
  0x26   : > { %s158_s5 = scalar_select %p157_p3, %s505_s16, 3 }
  0x27   : > { %s160_s6 = scalar_select %p159_p4, %s617_s3, 2 }
  0x28   : > { %s334_s7 = smul.u32 3, %s158_s5  ;;  %v524_v0 = vmov (!%p323_p5), 0.0  }
  0x29   : > { %178 = sbr.rel (%p323_p5) target bundleno = 48 (0x30), region = 28  ;;  %179 = vst [vmem:[%s628_s13] sm:$0xff] (!%p323_p5), %v524_v0  ;;  %180 = vst [vmem:[%s628_s13 + $0x8] sm:$0xff] (!%p323_p5), %v524_v0 }
  0x2a   : > { %s162_s8 = sadd.s32 %s334_s7, %s160_s6 }
  0x2b   : > { %s322_s9 = sshll.u32 %s162_s8, 3 }
  0x2c   : > { %s164_s12 = scalar_lea.vmem %s713_s1, %s322_s9 }
  0x30 PF: > { %v181_v1 = vld [vmem:[%s164_s12] sm:$0xff]  ;;  %v182_v2 = vld [vmem:[%s164_s12 + $0x8] sm:$0xff]  ;;  %s183_s21 = sld [smem:[#allocation3 + %s505_s16]]  ;;  %s640_s16 = scalar_lea.sflag [#allocation5], %s149_s30 }
  0x31   : > { %184 = vadd.xlane.f32.xlu0 %v181_v1  ;;  %v208_v20 = vld [vmem:[%s628_s13] sm:$0xff]  ;;  %v209_v25 = vld [vmem:[%s628_s13 + $0x8] sm:$0xff]  ;;  %s225_s22 = ssub.s32 (%p595_p8), 3, %s617_s3 }
  0x32   : > { %p226_p6 = scmp.lt.s32.totalorder (%p595_p8), %s225_s22, 2 }
  0x35   : > { %186 = vadd.xlane.f32.xlu0 %v182_v2 }
  0x36   : > { %v205_v17 = vstv %s183_s21 }
  0xbe   : > { %v185_v3 = vpop.xlane.xlu0 %184 }
  0xbf   : > { %v189_v4 = vmul.f32 0.0078125, %v185_v3 }
  0xc1   : > { %v191_v5 = vsub.f32 %v181_v1, %v189_v4 }
  0xc2   : > { %v187_v6 = vpop.xlane.xlu0 %186 }
  0xc3   : > { %v190_v7 = vmul.f32 0.0078125, %v187_v6  ;;  %v193_v8 = vmul.f32 %v191_v5, %v191_v5 }
  0xc5   : > { %v192_v9 = vsub.f32 %v182_v2, %v190_v7  ;;  %195 = vadd.xlane.f32.xlu1 %v193_v8 }
  0xc7   : > { %v194_v10 = vmul.f32 %v192_v9, %v192_v9 }
  0xc9   : > { %197 = vadd.xlane.f32.xlu1 %v194_v10 }
 0x152   : > { %v196_v11 = vpop.xlane.xlu1 %195 }
 0x153   : > { %v199_v12 = vmul.f32 0.0078125, %v196_v11 }
 0x155   : > { %v201_v13 = vadd.f32 1e-05, %v199_v12 }
 0x156   : > { %v198_v14 = vpop.xlane.xlu1 %197 }
 0x157   : > { %409 = vrsqrt.f32 %v201_v13  ;;  %v200_v15 = vmul.f32 0.0078125, %v198_v14 }
 0x159   : > { %v202_v16 = vadd.f32 1e-05, %v200_v15 }
 0x15b   : > { %411 = vrsqrt.f32 %v202_v16 }
 0x161   : > { %v410_v18 = vpop.eup %409 }
 0x162   : > { %v206_v19 = vmul.f32 %v410_v18, %v205_v17 }
 0x164   : > { %v210_v21 = vmul.f32 %v206_v19, %v191_v5 }
 0x165   : > { %v412_v22 = vpop.eup %411 }
 0x166   : > { %v212_v23 = vadd.f32 %v210_v21, %v208_v20  ;;  %v207_v24 = vmul.f32 %v412_v22, %v205_v17  ;;  %223 = sbr.rel (!%p595_p8) target bundleno = 393 (0x189), region = 32 }
 0x168   : > { %214 = vst [vmem:[%s628_s13] sm:$0xff] %v212_v23  ;;  %v211_v26 = vmul.f32 %v207_v24, %v192_v9 }
 0x16a   : > { %v213_v27 = vadd.f32 %v211_v26, %v209_v25 }
 0x16c   : > { %215 = vst [vmem:[%s628_s13 + $0x8] sm:$0xff] %v213_v27 }
 0x16d   : > { %s731_s22 = smov (!%p226_p6, %s225_s22), 2 }
 0x16e   : > { %s645_s27 = sshll.u32 %s731_s22, 7 }
 0x16f   : > { %s230_s28 = ssub.s32 256, %s645_s27 }
 0x170   : > { %231 = vsyncadd %s640_s16, %s230_s28  ;;  %p327_p7 = scmp.ne.s32.totalorder %s645_s27, 0  ;;  %s333_s30 = sshll.u32 %s509_s17, 8 }
 0x171   : > { %s654_s5 = scalar_lea.hbm %s714_s2, %s333_s30  ;;  %s236_s3 = sshll.u32 %s628_s13, 4  ;;  %s657_s3 = int_to_ptr.vmem [resolvable:$true] %s236_s3 }
 0x172   : > { %s425_s6 = scalar_lea.vmem %s657_s3, %s645_s27  ;;  %s525_s7 = smov [#allocation4]  }
 0x173   : > { %p426_p8 = scmp.ne.s32.totalorder %s657_s3, %s425_s6  ;;  %s429_s8 = sshll.u32 %s525_s7, 4  ;;  %s430_s8 = int_to_ptr.vmem [resolvable:$false] %s429_s8 }
 0x174   : > { %s431_s17 = scalar_lea.vmem %s430_s8, 512  ;;  %p432_p11 = scmp.lt.s32.totalorder %s657_s3, %s430_s8 }
 0x175   : > { %p427_p9 = pnand %p426_p8, %p327_p7  ;;  %p433_p12 = scmp.lt.s32.totalorder %s431_s17, %s425_s6 }
 0x177   : > { %p428_p10 = pneg %p427_p9  ;;  %p434_p13 = por %p433_p12, %p432_p11 }
 0x179   : > { %p435_p1 = pnand %p434_p13, %p428_p10 }
 0x17b   : > { %438 = shalt.err (!%p435_p1)
}
 0x17c   : > { %s439_s9 = scalar_lea.hbm %s654_s5, %s645_s27  ;;  %s443_s12 = scalar_lea.hbm %s714_s2, 384 }
 0x17d   : > { %p440_p2 = scmp.ne.s32.totalorder %s654_s5, %s439_s9  ;;  %p444_p5 = scmp.lt.u32.totalorder %s654_s5, %s714_s2 }
 0x17e   : > { %p445_p6 = scmp.lt.u32.totalorder %s443_s12, %s439_s9  ;;  %p447_p9 = scmp.lt.u32.totalorder %s439_s9, %s654_s5 }
 0x17f   : > { %p441_p3 = pnand %p440_p2, %p327_p7 }
 0x180   : > { %p446_p8 = por %p445_p6, %p444_p5 }
 0x181   : > { %p442_p4 = pneg %p441_p3 }
 0x182   : > { %p448_p10 = por %p447_p9, %p446_p8 }
 0x184   : > { %p449_p11 = pnand %p448_p10, %p442_p4 }
 0x186   : > { %452 = shalt.err (!%p449_p11)
}
 0x187   : > { %s526_s22 = smov 128   ;;  %s527_s28 = smov 8  }
 0x188   : > { %242 = dma.vmem_to_hbm [thread:$0]  (%p327_p7), %s657_s3, %s645_s27, %s654_s5, %s640_s16, %s526_s22, %s526_s22, %s527_s28  }
 0x189 PF: > { %p340_p12 = scmp.ge.s32.totalorder %s521_s20, 2  ;;  %s251_s30 = sand.u32 1, %s493_s14  }
 0x18a   : > { %s252_s4 = scalar_lea.sflag [#allocation5], %s251_s30 }
 0x18b   : > { %p337_p13 = pnand %p340_p12, %p605_p0 }
 0x18d   : > { %488 = dma.done.wait (!%p337_p13), %s252_s4, 256  }
 0x18e   : > { %490 = vsyncadd (!%p337_p13), %s252_s4, 4294967040  ;;  %s21_s20 = sadd.s32 1, %s521_s20   ;;  %s717_s14 = smov %s497_s15 }
 0x18f   : > { %p18_p1 = scmp.ge.s32.totalorder %s21_s20, 10   ;;  %s718_s15 = smov %s501_s0 }
 0x190   : > { %s719_s0 = smov %s613_s29  ;;  %s720_s16 = smov %s513_s18 }
 0x191   : > { %s721_s17 = smov %s517_s19  ;;  %s722_s18 = smov %s725_s23 }
 0x192   : > { %s723_s19 = smov %s729_s24  ;;  %20 = sbr.rel (!%p18_p1) target bundleno = 20 (0x14), region = 63 }
 0x199   :  { %257 = vsyncpa [#allocation5], 1 }
 0x19a   :  { %259 = vsyncpa [#allocation5 + $0x1], 1 }

</bundles_post_ra>
